<compile_context>
chip_gen: v5e
topology: v5e:2x2
jax: 0.10.0
libtpu: 0.0.40
codegen_flags: <defaults>
</compile_context>

<pallas_src>
import functools

import jax
import jax.numpy as jnp
from jax import lax
from jax.experimental import pallas as pl
from jax.experimental.pallas import tpu as pltpu


def _triplet_margin_kernel(margin_ref, nvalid_ref, a_ref, p_ref, n_ref,
                           out_ref, *, tile_n: int):
    """Per-tile: cosine sims along lanes, relu hinge, masked partial sum."""
    eps = jnp.float32(1e-8)
    i = pl.program_id(0)

    a = a_ref[...].astype(jnp.float32)
    p = p_ref[...].astype(jnp.float32)
    n = n_ref[...].astype(jnp.float32)

    # Row-wise dot products / squared norms along the feature (lane) axis.
    ap = jnp.sum(a * p, axis=1, keepdims=True)          # (tile_n, 1)
    an = jnp.sum(a * n, axis=1, keepdims=True)
    saa = jnp.sum(a * a, axis=1, keepdims=True)
    spp = jnp.sum(p * p, axis=1, keepdims=True)
    snn = jnp.sum(n * n, axis=1, keepdims=True)

    # ||a||*||p|| == sqrt(saa*spp) for nonnegative sums; eps clamps the
    # product of norms (matches PyTorch CosineSimilarity eps=1e-8 behavior).
    cos_ap = ap / jnp.maximum(jnp.sqrt(saa * spp), eps)
    cos_an = an / jnp.maximum(jnp.sqrt(saa * snn), eps)

    margin = margin_ref[0]                               # runtime SMEM scalar
    # dAP - dAN + margin == (1 - cos_ap) - (1 - cos_an) + margin
    hinge = jnp.maximum(cos_an - cos_ap + margin, jnp.float32(0.0))

    # Mask rows beyond the true batch size (tail tile / padded reads).
    row = lax.broadcasted_iota(jnp.int32, hinge.shape, 0) + i * tile_n
    hinge = jnp.where(row < nvalid_ref[0], hinge, jnp.float32(0.0))

    partial = jnp.sum(hinge)                              # scalar
    out_ref[...] = jnp.full(out_ref.shape, partial, dtype=out_ref.dtype)


def _choose_tile_n(n_rows: int, d: int,
                   vmem_budget_bytes: int = 12 * 1024 * 1024) -> int:
    """Pick a batch tile: 3 inputs x 2 buffers x tile*D*4 bytes <= budget."""
    t = vmem_budget_bytes // (24 * max(d, 1))
    t = max(8, (t // 8) * 8)
    t = min(t, 2048)
    return min(t, n_rows)


def triplet_margin_loss(anchor, positive, negative, *, margin=1.0,
                        margin_increment=0.0, epoch=0, tile_n=None):
    """JAX wrapper mirroring CustomTripletMarginLoss.forward."""
    if epoch <= -1:
        # PyTorch module would hit an undefined `currentMargin` (NameError).
        raise NameError("currentMargin is undefined for epoch <= -1")

    N, D = anchor.shape
    if tile_n is None:
        tile_n = _choose_tile_n(N, D)
    num_tiles = pl.cdiv(N, tile_n)

    # Runtime scalars (SMEM) -> no recompile when margin/epoch change.
    current_margin = (jnp.float32(margin)
                      + jnp.float32(margin_increment) * jnp.float32(epoch))
    margin_arr = jnp.reshape(current_margin, (1,)).astype(jnp.float32)
    nvalid_arr = jnp.asarray([N], dtype=jnp.int32)

    kernel = functools.partial(_triplet_margin_kernel, tile_n=tile_n)

    partials = pl.pallas_call(
        kernel,
        grid=(num_tiles,),
        in_specs=[
            pl.BlockSpec(memory_space=pltpu.SMEM),            # margin
            pl.BlockSpec(memory_space=pltpu.SMEM),            # valid rows
            pl.BlockSpec((tile_n, D), lambda i: (i, 0)),      # anchor
            pl.BlockSpec((tile_n, D), lambda i: (i, 0)),      # positive
            pl.BlockSpec((tile_n, D), lambda i: (i, 0)),      # negative
        ],
        out_specs=pl.BlockSpec((1, 8, 128), lambda i: (i, 0, 0)),
        out_shape=jax.ShapeDtypeStruct((num_tiles, 8, 128), jnp.float32),
        compiler_params=pltpu.CompilerParams(
            dimension_semantics=("parallel",),
            vmem_limit_bytes=32 * 1024 * 1024,
        ),
        cost_estimate=pl.CostEstimate(
            flops=10 * N * D,
            transcendentals=2 * N,
            bytes_accessed=12 * N * D,
        ),
    )(margin_arr, nvalid_arr, anchor, positive, negative)

    # Finish the mean with the true N (tail rows were masked to zero).
    return jnp.sum(partials[:, 0, 0]) / jnp.float32(N)


def _reference(anchor, positive, negative, margin, margin_increment, epoch):
    """Pure-JAX reference for correctness check."""
    eps = 1e-8
    current_margin = margin + margin_increment * epoch

    def cos(x1, x2):
        num = jnp.sum(x1 * x2, axis=1)
        den = jnp.maximum(
            jnp.linalg.norm(x1, axis=1) * jnp.linalg.norm(x2, axis=1), eps)
        return num / den

    d_ap = 1.0 - cos(anchor, positive)
    d_an = 1.0 - cos(anchor, negative)
    return jnp.mean(jax.nn.relu(d_ap - d_an + current_margin))


if __name__ == "__main__":
    key = jax.random.PRNGKey(0)

    # Case 1: small batch, single tile.
    k_a, k_p, k_n = jax.random.split(key, 3)
    N, D = 8, 32
    anchor = jax.random.normal(k_a, (N, D), dtype=jnp.float32)
    positive = jax.random.normal(k_p, (N, D), dtype=jnp.float32)
    negative = jax.random.normal(k_n, (N, D), dtype=jnp.float32)

    margin, margin_increment, epoch = 1.0, 0.1, 3
    loss = triplet_margin_loss(anchor, positive, negative,
                               margin=margin,
                               margin_increment=margin_increment,
                               epoch=epoch)
    loss = jax.block_until_ready(loss)
    ref = _reference(anchor, positive, negative, margin, margin_increment, epoch)
    assert jnp.allclose(loss, ref, atol=1e-5, rtol=1e-5), (loss, ref)

    # Case 2: multi-tile grid with a partial tail tile (exercises masking).
    k_a2, k_p2, k_n2 = jax.random.split(jax.random.PRNGKey(1), 3)
    N2, D2 = 20, 32
    a2 = jax.random.normal(k_a2, (N2, D2), dtype=jnp.float32)
    p2 = jax.random.normal(k_p2, (N2, D2), dtype=jnp.float32)
    n2 = jax.random.normal(k_n2, (N2, D2), dtype=jnp.float32)

    margin2, inc2, epoch2 = 0.5, 0.05, 5
    loss2 = triplet_margin_loss(a2, p2, n2, margin=margin2,
                                margin_increment=inc2, epoch=epoch2,
                                tile_n=8)   # 3 tiles, last one partial
    loss2 = jax.block_until_ready(loss2)
    ref2 = _reference(a2, p2, n2, margin2, inc2, epoch2)
    assert jnp.allclose(loss2, ref2, atol=1e-5, rtol=1e-5), (loss2, ref2)

    print("KERNEL_OK")
</pallas_src>

<mosaic_0001>
module attributes {stable_mosaic.version = 11 : i64} {
  func.func @_triplet_margin_kernel(%arg0: i32, %arg1: memref<1xf32, #tpu.memory_space<smem>>, %arg2: memref<1xi32, #tpu.memory_space<smem>>, %arg3: memref<8x32xf32, #tpu.memory_space<vmem>>, %arg4: memref<8x32xf32, #tpu.memory_space<vmem>>, %arg5: memref<8x32xf32, #tpu.memory_space<vmem>>, %arg6: memref<1x8x128xf32, #tpu.memory_space<vmem>>) attributes {dimension_semantics = [#tpu.dimension_semantics<parallel>], iteration_bounds = array<i64: 1>, scalar_prefetch = 0 : i64, scratch_operands = 0 : i64, tpu.core_type = #tpu.core_type<tc>, window_params = [{transform_indices = @transform_0, window_bounds = array<i64: 1>}, {transform_indices = @transform_1, window_bounds = array<i64: 1>}, {transform_indices = @transform_2, window_bounds = array<i64: 8, 32>}, {transform_indices = @transform_3, window_bounds = array<i64: 8, 32>}, {transform_indices = @transform_4, window_bounds = array<i64: 8, 32>}, {transform_indices = @transform_5, window_bounds = array<i64: 1, 8, 128>}]} {
    %c0 = arith.constant 0 : index
    %c0_0 = arith.constant 0 : index
    %0 = vector.load %arg3[%c0, %c0_0] : memref<8x32xf32, #tpu.memory_space<vmem>>, vector<8x32xf32>
    %c0_1 = arith.constant 0 : index
    %c0_2 = arith.constant 0 : index
    %1 = vector.load %arg4[%c0_1, %c0_2] : memref<8x32xf32, #tpu.memory_space<vmem>>, vector<8x32xf32>
    %c0_3 = arith.constant 0 : index
    %c0_4 = arith.constant 0 : index
    %2 = vector.load %arg5[%c0_3, %c0_4] : memref<8x32xf32, #tpu.memory_space<vmem>>, vector<8x32xf32>
    %3 = arith.mulf %0, %1 : vector<8x32xf32>
    %cst = arith.constant dense<0.000000e+00> : vector<8xf32>
    %4 = vector.multi_reduction <add>, %3, %cst [1] : vector<8x32xf32> to vector<8xf32>
    %5 = vector.shape_cast %4 : vector<8xf32> to vector<8x1xf32>
    %6 = arith.mulf %0, %2 : vector<8x32xf32>
    %cst_5 = arith.constant dense<0.000000e+00> : vector<8xf32>
    %7 = vector.multi_reduction <add>, %6, %cst_5 [1] : vector<8x32xf32> to vector<8xf32>
    %8 = vector.shape_cast %7 : vector<8xf32> to vector<8x1xf32>
    %9 = arith.mulf %0, %0 : vector<8x32xf32>
    %cst_6 = arith.constant dense<0.000000e+00> : vector<8xf32>
    %10 = vector.multi_reduction <add>, %9, %cst_6 [1] : vector<8x32xf32> to vector<8xf32>
    %11 = vector.shape_cast %10 : vector<8xf32> to vector<8x1xf32>
    %12 = arith.mulf %1, %1 : vector<8x32xf32>
    %cst_7 = arith.constant dense<0.000000e+00> : vector<8xf32>
    %13 = vector.multi_reduction <add>, %12, %cst_7 [1] : vector<8x32xf32> to vector<8xf32>
    %14 = vector.shape_cast %13 : vector<8xf32> to vector<8x1xf32>
    %15 = arith.mulf %2, %2 : vector<8x32xf32>
    %cst_8 = arith.constant dense<0.000000e+00> : vector<8xf32>
    %16 = vector.multi_reduction <add>, %15, %cst_8 [1] : vector<8x32xf32> to vector<8xf32>
    %17 = vector.shape_cast %16 : vector<8xf32> to vector<8x1xf32>
    %18 = arith.mulf %11, %14 : vector<8x1xf32>
    %19 = math.sqrt %18 : vector<8x1xf32>
    %cst_9 = arith.constant 9.99999993E-9 : f32
    %20 = vector.broadcast %cst_9 : f32 to vector<8x1xf32>
    %21 = arith.maximumf %19, %20 : vector<8x1xf32>
    %22 = arith.divf %5, %21 : vector<8x1xf32>
    %23 = arith.mulf %11, %17 : vector<8x1xf32>
    %24 = math.sqrt %23 : vector<8x1xf32>
    %cst_10 = arith.constant 9.99999993E-9 : f32
    %25 = vector.broadcast %cst_10 : f32 to vector<8x1xf32>
    %26 = arith.maximumf %24, %25 : vector<8x1xf32>
    %27 = arith.divf %8, %26 : vector<8x1xf32>
    %c0_11 = arith.constant 0 : index
    %28 = memref.load %arg1[%c0_11] : memref<1xf32, #tpu.memory_space<smem>>
    %29 = arith.subf %27, %22 : vector<8x1xf32>
    %30 = vector.broadcast %28 : f32 to vector<8x1xf32>
    %31 = arith.addf %29, %30 : vector<8x1xf32>
    %cst_12 = arith.constant 0.000000e+00 : f32
    %32 = vector.broadcast %cst_12 : f32 to vector<8x1xf32>
    %33 = arith.maximumf %31, %32 : vector<8x1xf32>
    %34 = tpu.iota {dimensions = array<i32: 0>} : vector<8x1xi32>
    %c8_i32 = arith.constant 8 : i32
    %35 = arith.muli %arg0, %c8_i32 : i32
    %36 = vector.broadcast %35 : i32 to vector<8x1xi32>
    %37 = arith.addi %34, %36 : vector<8x1xi32>
    %c0_13 = arith.constant 0 : index
    %38 = memref.load %arg2[%c0_13] : memref<1xi32, #tpu.memory_space<smem>>
    %39 = vector.broadcast %38 : i32 to vector<8x1xi32>
    %40 = arith.cmpi slt, %37, %39 : vector<8x1xi32>
    %cst_14 = arith.constant 0.000000e+00 : f32
    %41 = vector.broadcast %cst_14 : f32 to vector<8x1xf32>
    %42 = arith.select %40, %33, %41 : vector<8x1xi1>, vector<8x1xf32>
    %43 = vector.shape_cast %42 : vector<8x1xf32> to vector<1x8x1xf32>
    %cst_15 = arith.constant dense<0.000000e+00> : vector<1xf32>
    %44 = vector.multi_reduction <add>, %43, %cst_15 [1, 2] : vector<1x8x1xf32> to vector<1xf32>
    %45 = vector.shape_cast %44 : vector<1xf32> to vector<1x1x1xf32>
    %46 = vector.extract %45[0, 0, 0] : f32 from vector<1x1x1xf32>
    %47 = vector.broadcast %46 : f32 to vector<1x8x128xf32>
    %c0_16 = arith.constant 0 : index
    %c0_17 = arith.constant 0 : index
    %c0_18 = arith.constant 0 : index
    %48 = vector.load %arg6[%c0_16, %c0_17, %c0_18] : memref<1x8x128xf32, #tpu.memory_space<vmem>>, vector<1x8x128xf32>
    tpu.vector_store %arg6[%c0_16, %c0_17, %c0_18], %47 {strides = array<i32>} : memref<1x8x128xf32, #tpu.memory_space<vmem>>, vector<1x8x128xf32>,
    return
  }
  func.func @transform_0(%arg0: i32) -> i32 {
    %c0_i32 = arith.constant 0 : i32
    %c0_i32_0 = arith.constant 0 : i32
    return %c0_i32 : i32
  }
  func.func @transform_1(%arg0: i32) -> i32 {
    %c0_i32 = arith.constant 0 : i32
    %c0_i32_0 = arith.constant 0 : i32
    return %c0_i32 : i32
  }
  func.func @transform_2(%arg0: i32) -> (i32, i32) {
    %c0_i32 = arith.constant 0 : i32
    %c0_i32_0 = arith.constant 0 : i32
    return %arg0, %c0_i32 : i32, i32
  }
  func.func @transform_3(%arg0: i32) -> (i32, i32) {
    %c0_i32 = arith.constant 0 : i32
    %c0_i32_0 = arith.constant 0 : i32
    return %arg0, %c0_i32 : i32, i32
  }
  func.func @transform_4(%arg0: i32) -> (i32, i32) {
    %c0_i32 = arith.constant 0 : i32
    %c0_i32_0 = arith.constant 0 : i32
    return %arg0, %c0_i32 : i32, i32
  }
  func.func @transform_5(%arg0: i32) -> (i32, i32, i32) {
    %c0_i32 = arith.constant 0 : i32
    %c0_i32_0 = arith.constant 0 : i32
    %c0_i32_1 = arith.constant 0 : i32
    return %arg0, %c0_i32, %c0_i32_0 : i32, i32, i32
  }
}

</mosaic_0001>

<bundles_post_ra>
// kernel: tpu_custom_call.1
= control target key start
LH: loop header
LB: loop body
LE: loop exit
PB: predicated region body
PF: predicated region fallthrough
CT: control target
= control target key end

     0   :  { %12 = vsyncpa [#allocation5], 0  ;;  %s359_s0 = inlined_call_operand.<no memory space> [shape: f32[1], index: 0, kind: input, shape index: {}]   ;;  %s360_s1 = inlined_call_operand.<no memory space> [shape: s32[1], index: 1, kind: input, shape index: {}]   ;;  %s361_s2 = inlined_call_operand.hbm [shape: f32[8,32], index: 2, kind: input, shape index: {}]   ;;  %s362_s3 = inlined_call_operand.hbm [shape: f32[8,32], index: 3, kind: input, shape index: {}]   ;;  %s363_s4 = inlined_call_operand.hbm [shape: f32[8,32], index: 4, kind: input, shape index: {}]   ;;  %s364_s5 = inlined_call_operand.hbm [shape: f32[1,8,128], index: 5, kind: output, shape index: {}]  }
   0x1   :  { %13 = vsyncpa [#allocation8], 0  ;;  %s35_s20 = sshll.u32 %s362_s3, 4  ;;  %s36_s20 = int_to_ptr.hbm [resolvable:$true] %s35_s20 }
   0x2   :  { %14 = vsyncpa [#allocation6], 0  ;;  %s307_s21 = smov [#allocation7]   ;;  %s24_s25 = sshll.u32 %s361_s2, 4  ;;  %s25_s25 = int_to_ptr.hbm [resolvable:$true] %s24_s25 }
   0x3   :  { %s37_s22 = sshll.u32 %s307_s21, 4  ;;  %s308_s26 = smov [#allocation4]   ;;  %s38_s22 = int_to_ptr.vmem [resolvable:$true] %s37_s22 }
   0x4   :  { %40 = dma.hbm_to_vmem [thread:$0]  %s36_s20, 128, %s38_s22, [#allocation8]  }
   0x5   :  { %s26_s27 = sshll.u32 %s308_s26, 4  ;;  %s46_s30 = sshll.u32 %s363_s4, 4  ;;  %s27_s27 = int_to_ptr.vmem [resolvable:$true] %s26_s27  ;;  %s47_s30 = int_to_ptr.hbm [resolvable:$true] %s46_s30 }
   0x6   :  { %29 = dma.hbm_to_vmem [thread:$0]  %s25_s25, 128, %s27_s27, [#allocation5]  }
   0x7   :  { %s309_s3 = smov [#allocation9]  }
   0x8   :  { %s48_s6 = sshll.u32 %s309_s3, 4  ;;  %s49_s6 = int_to_ptr.vmem [resolvable:$true] %s48_s6 }
   0x9   :  { %51 = dma.hbm_to_vmem [thread:$0]  %s47_s30, 128, %s49_s6, [#allocation8]  }
   0xa   :  { %301 = dma.done.wait [#allocation5], 128  }
   0xb   :  { %302 = vsyncadd [#allocation5], 4294967168 }
   0xc   :  { %303 = dma.done.wait [#allocation8], 256  }
   0xd   :  { %304 = vsyncadd [#allocation8], 4294967040  ;;  %v66_v0 = vld [vmem:[#allocation9] sm:$0xff]  ;;  %vm68_vm0 = vcmask 261120   ;;  %v64_v1 = vld [vmem:[#allocation4] sm:$0xff]  ;;  %v151_v60 = vlaneseq  ;;  %vm160_vm14 = vcmask 7168  }
   0xe   :  { %v84_v2 = vmul.f32 %v66_v0, %v66_v0  ;;  %v76_v3 = vmul.f32 %v64_v1, %v64_v1  ;;  %v72_v4 = vmul.f32 %v66_v0, %v64_v1  ;;  %v65_v5 = vld [vmem:[#allocation7] sm:$0xff] }
   0xf   :  { %v80_v9 = vmul.f32 %v65_v5, %v65_v5  ;;  %v67_v10 = vmul.f32 %v65_v5, %v64_v1  ;;  %v148_v1 = vstv %s359_s0  ;;  %s310_s0 = smov [#allocation10]  }
  0x10   :  { %v85_v6 = vsel %vm68_vm0, %v84_v2, 0.0  ;;  %v77_v7 = vsel %vm68_vm0, %v76_v3, 0.0  ;;  %v73_v8 = vsel %vm68_vm0, %v72_v4, 0.0  ;;  %v152_v2 = vshrl.u32 %v151_v60, 7  ;;  %s178_s9 = sshll.u32 %s310_s0, 4  ;;  %s179_s9 = int_to_ptr.vmem [resolvable:$true] %s178_s9 }
  0x11   :  { %86 = vadd.xlane.f32.xlu1 %v85_v6  ;;  %78 = vadd.xlane.f32.xlu0 %v77_v7  ;;  %v81_v11 = vsel %vm68_vm0, %v80_v9, 0.0  ;;  %v69_v12 = vsel %vm68_vm0, %v67_v10, 0.0  ;;  %v157_v4 = vstv %s360_s1  ;;  %s180_s1 = sshll.u32 %s364_s5, 4  ;;  %s181_s1 = int_to_ptr.hbm [resolvable:$true] %s180_s1 }
  0x12   :  { %74 = vadd.xlane.f32.xlu2 %v73_v8  ;;  %vm158_vm13 = vcmp.lt.s32.totalorder %v152_v2, %v157_v4 }
  0x19   :  { %82 = vadd.xlane.f32.xlu0 %v81_v11  ;;  %70 = vadd.xlane.f32.xlu1 %v69_v12 }
  0x84   :  { %v87_v13 = vpop.xlane.xlu1 %86  ;;  %v79_v14 = vpop.xlane.xlu0 %78 }
  0x85   :  { %v117_v15 = vmul.f32 %v87_v13, %v79_v14  ;;  %v75_v57 = vpop.xlane.xlu2 %74 }
  0x87   :  { %197 = vrsqrt.f32 %v117_v15  ;;  %vm125_vm1 = vcmp.eq.f32.partialorder %v117_v15, inf  ;;  %v128_v28 = vand.u32 2147483648, %v117_v15  ;;  %vm127_vm2 = vcmp.eq.f32.partialorder %v117_v15, 0.0 }
  0x8c   :  { %v83_v16 = vpop.xlane.xlu0 %82  ;;  %v71_v59 = vpop.xlane.xlu1 %70 }
  0x8d   :  { %v198_v17 = vpop.eup %197  ;;  %v88_v18 = vmul.f32 %v83_v16, %v79_v14 }
  0x8e   :  { %v119_v19 = vmul.f32 %v198_v17, %v117_v15 }
  0x8f   :  { %199 = vrsqrt.f32 %v88_v18  ;;  %vm96_vm3 = vcmp.eq.f32.partialorder %v88_v18, inf  ;;  %v99_v36 = vand.u32 2147483648, %v88_v18  ;;  %vm98_vm4 = vcmp.eq.f32.partialorder %v88_v18, 0.0 }
  0x90   :  { %v120_v20 = vmul.f32 %v198_v17, %v119_v19 }
  0x92   :  { %v121_v21 = vmul.f32 0.5, %v120_v20 }
  0x94   :  { %v122_v22 = vsub.f32 1.5, %v121_v21 }
  0x95   :  { %v200_v23 = vpop.eup %199 }
  0x96   :  { %v90_v24 = vmul.f32 %v200_v23, %v88_v18  ;;  %v123_v25 = vmul.f32 %v198_v17, %v122_v22 }
  0x98   :  { %v91_v26 = vmul.f32 %v200_v23, %v90_v24  ;;  %v124_v27 = vmul.f32 %v123_v25, %v117_v15 }
  0x9a   :  { %v92_v29 = vmul.f32 0.5, %v91_v26  ;;  %v126_v30 = vsel %vm125_vm1, %v117_v15, %v124_v27 }
  0x9b   :  { %v129_v31 = vsel %vm127_vm2, %v128_v28, %v126_v30 }
  0x9c   :  { %v130_v32 = vmax.f32 %v129_v31, 1e-08  ;;  %v93_v33 = vsub.f32 1.5, %v92_v29 }
  0x9e   :  { %201 = vrcp.f32 %v130_v32  ;;  %v94_v34 = vmul.f32 %v200_v23, %v93_v33  ;;  %v142_v47 = vand.u32 2147483648, %v130_v32  ;;  %vm136_vm6 = vweird.f32 %v130_v32 }
  0x9f   :  { %v140_v48 = vand.u32 2147483647, %v130_v32 }
  0xa0   :  { %v95_v35 = vmul.f32 %v94_v34, %v88_v18  ;;  %v143_v54 = vor.u32 1.1754944e-38, %v142_v47 }
  0xa1   :  { %vm141_vm9 = vcmp.eq.f32.partialorder %v140_v48, 8.507059e+37 }
  0xa2   :  { %v97_v37 = vsel %vm96_vm3, %v88_v18, %v95_v35 }
  0xa3   :  { %v100_v39 = vsel %vm98_vm4, %v99_v36, %v97_v37 }
  0xa4   :  { %v202_v38 = vpop.eup %201  ;;  %v101_v41 = vmax.f32 %v100_v39, 1e-08 }
  0xa5   :  { %v132_v40 = vmul.f32 %v202_v38, %v130_v32  ;;  %vm137_vm5 = vweird.f32 %v202_v38 }
  0xa6   :  { %203 = vrcp.f32 %v101_v41  ;;  %vm138_vm7 = vmor %vm136_vm6, %vm137_vm5  ;;  %v113_v50 = vand.u32 2147483648, %v101_v41  ;;  %v111_v53 = vand.u32 2147483647, %v101_v41  ;;  %vm107_vm10 = vweird.f32 %v101_v41 }
  0xa7   :  { %v133_v42 = vsub.f32 1.0, %v132_v40 }
  0xa8   :  { %v114_v58 = vor.u32 1.1754944e-38, %v113_v50  ;;  %vm112_vm12 = vcmp.eq.f32.partialorder %v111_v53, 8.507059e+37 }
  0xa9   :  { %v134_v43 = vmul.f32 %v202_v38, %v133_v42 }
  0xab   :  { %v135_v45 = vadd.f32 %v202_v38, %v134_v43 }
  0xac   :  { %v204_v44 = vpop.eup %203 }
  0xad   :  { %v103_v46 = vmul.f32 %v204_v44, %v101_v41  ;;  %v139_v51 = vsel %vm138_vm7, %v202_v38, %v135_v45  ;;  %vm108_vm8 = vweird.f32 %v204_v44 }
  0xae   :  { %v144_v56 = vsel %vm141_vm9, %v143_v54, %v139_v51  ;;  %vm109_vm11 = vmor %vm107_vm10, %vm108_vm8 }
  0xaf   :  { %v104_v49 = vsub.f32 1.0, %v103_v46  ;;  %v145_v63 = vmul.f32 %v144_v56, %v75_v57 }
  0xb1   :  { %v105_v52 = vmul.f32 %v204_v44, %v104_v49 }
  0xb3   :  { %v106_v55 = vadd.f32 %v204_v44, %v105_v52 }
  0xb5   :  { %v110_v61 = vsel %vm109_vm11, %v204_v44, %v106_v55 }
  0xb6   :  { %v115_v62 = vsel %vm112_vm12, %v114_v58, %v110_v61 }
  0xb7   :  { %v116_v0 = vmul.f32 %v115_v62, %v71_v59 }
  0xb9   :  { %v147_v3 = vsub.f32 %v145_v63, %v116_v0 }
  0xbb   :  { %v149_v5 = vadd.f32 %v148_v1, %v147_v3 }
  0xbd   :  { %v150_v6 = vmax.f32 %v149_v5, 0.0 }
  0xbf   :  { %v159_v7 = vsel %vm158_vm13, %v150_v6, 0.0 }
  0xc0   :  { %v161_v8 = vsel %vm160_vm14, %v159_v7, 0.0 }
  0xc1   :  { %162 = vadd.xlane.f32.xlu2 %v161_v8 }
 0x134   :  { %v163_v9 = vpop.xlane.xlu2 %162 }
 0x135   :  { %v164_v10 = vrot.slane %v163_v9, 4 }
 0x137   :  { %v165_v11 = vadd.f32 %v164_v10, %v163_v9 }
 0x139   :  { %v166_v12 = vrot.slane %v165_v11, 2 }
 0x13b   :  { %v167_v13 = vadd.f32 %v166_v12, %v165_v11 }
 0x13d   :  { %v168_v14 = vrot.slane %v167_v13, 1 }
 0x13f   :  { %v169_v15 = vadd.f32 %v168_v14, %v167_v13 }
 0x141   :  { %191 = vpush %v169_v15 }
 0x172   :  { %s192_s12 = spop %191 }
 0x173   :  { %v171_v16 = vstv %s192_s12 }
 0x174   :  { %172 = vst [vmem:[#allocation10] sm:$0xff] %v171_v16 }
 0x175   :  { %183 = dma.vmem_to_hbm [thread:$0]  %s179_s9, 128, %s181_s1, [#allocation6]  }
 0x176   :  { %305 = dma.done.wait [#allocation6], 128  }
 0x177   :  { %306 = vsyncadd [#allocation6], 4294967168 }
 0x178   :  { %188 = vsyncpa [#allocation5], 1 }
 0x179   :  { %189 = vsyncpa [#allocation8], 1 }
 0x17a   :  { %190 = vsyncpa [#allocation6], 1 }

</bundles_post_ra>
